<compile_context>
chip_gen: v6e
topology: v6e:2x2x1
jax: 0.10.0
libtpu: 0.0.40
codegen_flags: <defaults>
</compile_context>

<pallas_src>
import jax
import jax.numpy as jnp
from jax.experimental import pallas as pl
from jax.experimental.pallas import tpu as pltpu

LANE = 128
_SUBLANES = {1: 32, 2: 16, 4: 8}            # sublane packing by itemsize
_TARGET_TILE_BYTES = 4 * 1024 * 1024        # ~4 MiB per input tile (x2 buffered)


def _default_num_slices():
    # v7x has 2 TensorCores per chip; shard the leading "parallel" axis across
    # them.  v5e/v6e have a single TC, where extra slices only add epilogue.
    try:
        kind = jax.devices()[0].device_kind.lower()
    except Exception:
        return 1
    return 2 if "v7" in kind else 1


def _wgen_sum_kernel(x_ref, o_ref):
    """Per-slice partial sum over a lane-dense (rows, 128) slab.

    grid = (num_slices, steps).  The output block o_ref (acc_rows, 128) f32 is
    resident in VMEM across the step axis and doubles as the accumulator:
    per-step work is pure VPU adds (overlaps the next tile's DMA); the
    cross-lane/sublane reduction is done in the wrapper.
    """
    @pl.when(pl.program_id(1) == 0)
    def _():
        o_ref[...] = jnp.zeros_like(o_ref)

    acc_rows = o_ref.shape[0]
    x = x_ref[...].astype(jnp.float32)                 # (tm, 128), tm % acc_rows == 0
    # Folding into (acc_rows, 128) keeps acc_rows/8 independent vreg add chains
    # (ILP for the 4 VALU slots) instead of one long dependent chain.
    o_ref[...] += jnp.sum(x.reshape(-1, acc_rows, LANE), axis=0)


def wgen_loss(d_fake_prediction, *, target_tile_bytes=_TARGET_TILE_BYTES,
              num_slices=None, small_input_threshold=65536):
    """Pallas TPU WGenLoss.forward: -mean(x).  Returns a scalar float32."""
    x = d_fake_prediction
    if x.dtype == jnp.float64:
        # Pallas TPU has no f64; accumulate in f32 instead.
        x = x.astype(jnp.float32)
    # TODO(synk): torch.mean raises on integer tensors; here integer/bool inputs
    # are streamed in their native dtype and accumulated in f32 (float mean).
    flat = x.reshape(-1)
    n = flat.shape[0]
    if n == 0:
        return jnp.float32(jnp.nan)                    # matches torch.mean of empty

    itemsize = flat.dtype.itemsize
    sub = _SUBLANES.get(itemsize, 8)
    rows_full = n // LANE                              # complete 128-lane rows

    # Tiny inputs: XLA's fused reduce beats the pallas_call machinery, and
    # below one minimal tile there is nothing to tile.
    if n <= small_input_threshold or rows_full < sub:
        return -jnp.mean(flat.astype(jnp.float32))

    if num_slices is None:
        num_slices = _default_num_slices()
    num_slices = max(1, int(num_slices))
    if rows_full < num_slices * sub:
        num_slices = 1

    # ---- tile geometry: size tiles by bytes, not rows ----------------------
    max_tile_rows = max(sub, target_tile_bytes // (LANE * itemsize))
    rows_per_slice = rows_full // num_slices
    steps = max(1, pl.cdiv(rows_per_slice, max_tile_rows))
    base_tm = rows_per_slice // steps
    acc_rows = 32 if base_tm >= 32 else sub            # 32 covers every packing
    tm = (base_tm // acc_rows) * acc_rows              # rows per grid step
    if tm == 0:
        return -jnp.mean(flat.astype(jnp.float32))

    kernel_rows = num_slices * steps * tm              # rows covered by the kernel
    kernel_elems = kernel_rows * LANE                  # <= n, never padded

    # Aligned prefix as a lane-dense (rows, 128) slab in the NATIVE dtype.
    # In the common case it covers the whole tensor -> pure metadata reshape,
    # no wrapper-side pad/cast copy.
    x2d = (flat if kernel_elems == n else flat[:kernel_elems]).reshape(
        kernel_rows, LANE)

    tile_bytes = tm * LANE * itemsize
    out_block_bytes = acc_rows * LANE * 4
    vmem_limit = int(max(16 << 20,
                         min(2 * tile_bytes + 2 * out_block_bytes + (2 << 20),
                             64 << 20)))

    partials = pl.pallas_call(
        _wgen_sum_kernel,
        out_shape=jax.ShapeDtypeStruct((num_slices * acc_rows, LANE),
                                       jnp.float32),
        grid_spec=pltpu.PrefetchScalarGridSpec(
            num_scalar_prefetch=0,
            grid=(num_slices, steps),
            in_specs=[pl.BlockSpec((tm, LANE),
                                   lambda s, i: (s * steps + i, 0))],
            out_specs=pl.BlockSpec((acc_rows, LANE), lambda s, i: (s, 0)),
        ),
        compiler_params=pltpu.CompilerParams(
            dimension_semantics=("parallel", "arbitrary"),
            vmem_limit_bytes=vmem_limit,
        ),
        cost_estimate=pl.CostEstimate(
            flops=kernel_elems,
            bytes_accessed=kernel_elems * itemsize
                           + num_slices * out_block_bytes,
            transcendentals=0),
    )(x2d)

    total = jnp.sum(partials)                          # tiny wrapper reduce
    if kernel_elems < n:                               # ragged tail (small)
        total = total + jnp.sum(flat[kernel_elems:].astype(jnp.float32))
    return -(total / jnp.float32(n))


if __name__ == "__main__":
    key = jax.random.PRNGKey(0)
    k1, k2, k3 = jax.random.split(key, 3)

    # Typical (small) patch-GAN style discriminator output [B, C, H, W].
    d_fake = jax.random.normal(k1, (2, 4, 16, 16), dtype=jnp.float32)
    ref = -jnp.mean(d_fake)

    # 1) Default call on the tiny demo input hits the -jnp.mean fast path.
    loss_fast = jax.block_until_ready(wgen_loss(d_fake))
    assert jnp.allclose(loss_fast, ref, atol=1e-6, rtol=1e-6), (loss_fast, ref)

    # 2) Force the Pallas path (single-step, whole-slab tile).
    loss_pl = jax.block_until_ready(wgen_loss(d_fake, small_input_threshold=0))
    assert jnp.allclose(loss_pl, ref, atol=1e-6, rtol=1e-6), (loss_pl, ref)

    # 3) Multi-step grid (tiny target tile bytes): exercises the resident
    #    output-block accumulator across steps.
    loss_ms = jax.block_until_ready(
        wgen_loss(d_fake, small_input_threshold=0, target_tile_bytes=4096))
    assert jnp.allclose(loss_ms, ref, atol=1e-6, rtol=1e-6), (loss_ms, ref)

    # 4) bf16 input with a ragged size (not a multiple of 128): streamed in its
    #    native dtype; the kernel covers the aligned prefix, the small tail is
    #    folded in the wrapper epilogue (no jnp.pad copy).
    d_fake_bf16 = jax.random.normal(
        k2, (3, 1, 37, 41), dtype=jnp.float32).astype(jnp.bfloat16)
    ref_bf16 = -jnp.mean(d_fake_bf16.astype(jnp.float32))
    loss_bf16 = jax.block_until_ready(
        wgen_loss(d_fake_bf16, small_input_threshold=0))
    assert jnp.allclose(loss_bf16, ref_bf16, atol=1e-3, rtol=1e-3), (
        loss_bf16, ref_bf16)

    # 5) Larger f32 input split over 2 slices (leading "parallel" axis; the
    #    slices run on both TCs on v7x, sequentially elsewhere).
    d_big = jax.random.normal(k3, (8, 8, 64, 64), dtype=jnp.float32)
    ref_big = -jnp.mean(d_big)
    loss_big = jax.block_until_ready(wgen_loss(d_big, num_slices=2))
    assert jnp.allclose(loss_big, ref_big, atol=1e-4, rtol=1e-4), (
        loss_big, ref_big)

    print("KERNEL_OK")
</pallas_src>

<mosaic_0001>
module attributes {stable_mosaic.version = 11 : i64} {
  func.func @_wgen_sum_kernel(%arg0: i32, %arg1: i32, %arg2: memref<16x128xf32, #tpu.memory_space<vmem>>, %arg3: memref<8x128xf32, #tpu.memory_space<vmem>>) attributes {dimension_semantics = [#tpu.dimension_semantics<parallel>, #tpu.dimension_semantics<arbitrary>], iteration_bounds = array<i64: 1, 1>, scalar_prefetch = 0 : i64, scratch_operands = 0 : i64, tpu.core_type = #tpu.core_type<tc>, window_params = [{transform_indices = @transform_0, window_bounds = array<i64: 16, 128>}, {transform_indices = @transform_1, window_bounds = array<i64: 8, 128>}]} {
    %c0_i32 = arith.constant 0 : i32
    %0 = arith.cmpi eq, %arg1, %c0_i32 : i32
    %1 = arith.extui %0 : i1 to i32
    %c0_i32_0 = arith.constant 0 : i32
    %2 = arith.cmpi ne, %1, %c0_i32_0 : i32
    scf.if %2 {
      %cst_6 = arith.constant 0.000000e+00 : f32
      %9 = vector.broadcast %cst_6 : f32 to vector<8x128xf32>
      %c0_7 = arith.constant 0 : index
      %c0_8 = arith.constant 0 : index
      %10 = vector.load %arg3[%c0_7, %c0_8] : memref<8x128xf32, #tpu.memory_space<vmem>>, vector<8x128xf32>
      tpu.vector_store %arg3[%c0_7, %c0_8], %9 {strides = array<i32>} : memref<8x128xf32, #tpu.memory_space<vmem>>, vector<8x128xf32>,
    } else {
    }
    %c0 = arith.constant 0 : index
    %c0_1 = arith.constant 0 : index
    %3 = vector.load %arg2[%c0, %c0_1] : memref<16x128xf32, #tpu.memory_space<vmem>>, vector<16x128xf32>
    %c0_2 = arith.constant 0 : index
    %c0_3 = arith.constant 0 : index
    %4 = vector.load %arg3[%c0_2, %c0_3] : memref<8x128xf32, #tpu.memory_space<vmem>>, vector<8x128xf32>
    %5 = vector.shape_cast %3 : vector<16x128xf32> to vector<2x8x128xf32>
    %cst = arith.constant dense<0.000000e+00> : vector<8x128xf32>
    %6 = vector.multi_reduction <add>, %5, %cst [0] : vector<2x8x128xf32> to vector<8x128xf32>
    %7 = arith.addf %4, %6 : vector<8x128xf32>
    %c0_4 = arith.constant 0 : index
    %c0_5 = arith.constant 0 : index
    %8 = vector.load %arg3[%c0_4, %c0_5] : memref<8x128xf32, #tpu.memory_space<vmem>>, vector<8x128xf32>
    tpu.vector_store %arg3[%c0_4, %c0_5], %7 {strides = array<i32>} : memref<8x128xf32, #tpu.memory_space<vmem>>, vector<8x128xf32>,
    return
  }
  func.func @transform_0(%arg0: i32, %arg1: i32) -> (i32, i32) {
    %c1_i32 = arith.constant 1 : i32
    %0 = arith.muli %arg0, %c1_i32 : i32
    %1 = arith.addi %0, %arg1 : i32
    %c0_i32 = arith.constant 0 : i32
    %c0_i32_0 = arith.constant 0 : i32
    return %1, %c0_i32 : i32, i32
  }
  func.func @transform_1(%arg0: i32, %arg1: i32) -> (i32, i32) {
    %c0_i32 = arith.constant 0 : i32
    %c0_i32_0 = arith.constant 0 : i32
    return %arg0, %c0_i32 : i32, i32
  }
}

</mosaic_0001>

<bundles_post_ra>
// kernel: tpu_custom_call.1
= control target key start
LH: loop header
LB: loop body
LE: loop exit
PB: predicated region body
PF: predicated region fallthrough
CT: control target
= control target key end

     0   :  { %6 = vsyncpa [#allocation3], 0  ;;  %s124_s0 = inlined_call_operand.hbm [shape: f32[16,128], index: 0, kind: input, shape index: {}]   ;;  %s125_s1 = inlined_call_operand.hbm [shape: f32[8,128], index: 1, kind: output, shape index: {}]  }
   0x1   :  { %7 = vsyncpa [#allocation4], 0  ;;  %s104_s6 = smov [#allocation2]  }
   0x2   :  { %s17_s7 = sshll.u32 %s104_s6, 4  ;;  %s18_s7 = int_to_ptr.vmem [resolvable:$true] %s17_s7 }
   0x3   :  { %s68_s8 = scalar_lea.vmem %s18_s7, 256  ;;  %p73_p1 = scmp.lt.s32.totalorder %s18_s7, %s18_s7 }
   0x4   :  { %p69_p0 = scmp.ne.s32.totalorder %s18_s7, %s68_s8  ;;  %p74_p2 = scmp.lt.s32.totalorder %s68_s8, %s68_s8 }
   0x6   :  { %p75_p3 = por %p74_p2, %p73_p1 }
   0x8   :  { %p76_p4 = pnand %p75_p3, %p69_p0 }
   0xa   :  { %79 = shalt.err (!%p76_p4)
}
   0xb   :  { %s105_s9 = smov 128   ;;  %s106_s10 = smov 8  }
   0xc   :  { %23 = dma.hbm_to_vmem [thread:$0]  %s124_s0, 256, %s18_s7, [#allocation3], %s105_s9, %s105_s9, %s106_s10  }
   0xd   :  { %100 = dma.done.wait [#allocation3], 256  }
   0xe   :  { %101 = vsyncadd [#allocation3], 4294967040  ;;  %v34_v0 = vld [vmem:[#allocation2] sm:$0xff]  ;;  %v35_v1 = vld [vmem:[#allocation2 + $0x8] sm:$0xff]  ;;  %s107_s13 = smov [#allocation5]  }
   0xf   :  { %s46_s14 = sshll.u32 %s107_s13, 4  ;;  %v37_v2 = vadd.f32 %v35_v1, %v34_v0  ;;  %s47_s14 = int_to_ptr.vmem [resolvable:$true] %s46_s14 }
  0x10   :  { %s80_s15 = scalar_lea.vmem %s47_s14, 128  ;;  %p85_p6 = scmp.lt.s32.totalorder %s47_s14, %s47_s14 }
  0x11   :  { %39 = vst [vmem:[#allocation5] sm:$0xff] %v37_v2  ;;  %p81_p5 = scmp.ne.s32.totalorder %s47_s14, %s80_s15  ;;  %p86_p7 = scmp.lt.s32.totalorder %s80_s15, %s80_s15 }
  0x13   :  { %p87_p8 = por %p86_p7, %p85_p6 }
  0x15   :  { %p88_p9 = pnand %p87_p8, %p81_p5 }
  0x17   :  { %91 = shalt.err (!%p88_p9)
}
  0x18   :  { %49 = dma.vmem_to_hbm [thread:$0]  %s47_s14, 128, %s125_s1, [#allocation4]  }
  0x19   :  { %102 = dma.done.wait [#allocation4], 128  }
  0x1a   :  { %103 = vsyncadd [#allocation4], 4294967168 }
  0x1b   :  { %53 = vsyncpa [#allocation3], 1 }
  0x1c   :  { %54 = vsyncpa [#allocation4], 1 }

</bundles_post_ra>
